<compile_context>
chip_gen: v5e
topology: v5e:2x2
jax: 0.10.0
libtpu: 0.0.40
codegen_flags: <defaults>
</compile_context>

<pallas_src>
import math
from functools import partial

import jax
import jax.numpy as jnp
from jax.experimental import pallas as pl
from jax.experimental.pallas import tpu as pltpu


# ----------------------------------------------------------------------------
# Kernel: fused 3-layer MLP on one lane-dense batch tile (f32 accumulation).
# ----------------------------------------------------------------------------
def rule_encoder_kernel(x_ref, w1_ref, b1_ref, w2_ref, b2_ref, w3_ref, b3_ref,
                        o_ref):
    cdt = w1_ref.dtype  # matmul-operand dtype (f32 default, bf16 optional)

    # Layer 1: Linear + ReLU
    h = jnp.dot(x_ref[...].astype(cdt), w1_ref[...],
                preferred_element_type=jnp.float32)
    h = jnp.maximum(h + b1_ref[...], 0.0)

    # Layer 2: Linear + ReLU
    h = jnp.dot(h.astype(cdt), w2_ref[...],
                preferred_element_type=jnp.float32)
    h = jnp.maximum(h + b2_ref[...], 0.0)

    # Layer 3: Linear (no activation)
    out = jnp.dot(h.astype(cdt), w3_ref[...],
                  preferred_element_type=jnp.float32)
    o_ref[...] = (out + b3_ref[...]).astype(o_ref.dtype)


# ----------------------------------------------------------------------------
# Host-side helpers.
# ----------------------------------------------------------------------------
def _num_tensorcores():
    """Best-effort TensorCores-per-device (2 on v7x / megacore, else 1)."""
    try:
        d = jax.devices()[0]
        n = getattr(d, "num_cores", None)
        if n:
            return int(n)
        kind = str(getattr(d, "device_kind", "")).lower()
        if any(tag in kind for tag in ("v7", "v4", "v5p")):
            return 2
    except Exception:
        pass
    return 1


def _compute_pack(input_dim, hidden_dim, output_dim):
    """Smallest pack with output_dim*pack % 128 == 0 and hidden_dim*pack >= 128,
    bounded so the packed block-diagonal w2 stays tiny (< ~4 MiB)."""
    pack_out = math.lcm(output_dim, 128) // output_dim
    pack = pack_out
    if hidden_dim * pack < 128:
        pack = pack_out * pl.cdiv(128, hidden_dim * pack_out)
    if (hidden_dim * pack) ** 2 * 4 > (4 << 20):
        pack = pack_out
        if (hidden_dim * pack) ** 2 * 4 > (4 << 20):
            # Perf-cliff fallback (masked narrow stores) for exotic dims only.
            pack = 1
    return pack


def pack_rule_encoder_params(params, *, matmul_dtype=jnp.float32):
    """One-time packing: block-diagonal kron(I_pack, W) weights + tiled biases.

    Weights are stored as (in_features, out_features) — the transpose of
    PyTorch's nn.Linear.weight — so the kernel computes y = x @ W + b directly.
    Returns (packed_param_dict, pack).
    """
    input_dim, hidden_dim = params["w1"].shape
    output_dim = params["w3"].shape[1]
    pack = _compute_pack(input_dim, hidden_dim, output_dim)

    eye = jnp.eye(pack, dtype=jnp.float32)
    packed = {
        "w1": jnp.kron(eye, params["w1"].astype(jnp.float32)).astype(matmul_dtype),
        "w2": jnp.kron(eye, params["w2"].astype(jnp.float32)).astype(matmul_dtype),
        "w3": jnp.kron(eye, params["w3"].astype(jnp.float32)).astype(matmul_dtype),
        "b1": jnp.tile(params["b1"].astype(jnp.float32), (1, pack)),
        "b2": jnp.tile(params["b2"].astype(jnp.float32), (1, pack)),
        "b3": jnp.tile(params["b3"].astype(jnp.float32), (1, pack)),
    }
    return packed, pack


@partial(jax.jit, static_argnames=("pack", "batch_tile"))
def rule_encoder_forward(x, packed, *, pack, batch_tile=None):
    """x: (B, input_dim) f32.  packed/pack: from pack_rule_encoder_params."""
    B, input_dim = x.shape
    in_p = packed["w1"].shape[0]    # input_dim  * pack
    hid_p = packed["w1"].shape[1]   # hidden_dim * pack
    out_p = packed["w3"].shape[1]   # output_dim * pack
    output_dim = out_p // pack
    dtype = x.dtype

    # ---- batch tiling (generation-aware) ------------------------------------
    p_rows = pl.cdiv(B, pack)                       # packed rows needed
    cores = _num_tensorcores()
    if batch_tile is None:
        # ~4 MiB x-tile cap: amortizes the ~0.35 us/step cost to <10% and keeps
        # the double-buffered working set (~12 MiB) far under 32 MiB scoped
        # VMEM on every generation (incl. v7x's 64 MiB physical / TC).
        cap_p = max(8, ((4 << 20) // (in_p * 4)) // 8 * 8)
        if cores >= 2 and p_rows > 16:
            # Split only where it buys a second TensorCore (v7x / megacore).
            tile_p = min(cap_p, pl.cdiv(p_rows, cores))
        else:
            # Single-TC (v5e/v6e): the grid is a serial loop — one step if it fits.
            tile_p = min(cap_p, p_rows)
    else:
        tile_p = max(1, batch_tile // pack)
    tile_p = max(8, pl.cdiv(tile_p, 8) * 8)         # sublane-aligned

    grid_len = pl.cdiv(p_rows, tile_p)
    if cores >= 2 and grid_len > 1 and grid_len % cores:
        # Keep both TCs busy on the tail: round step count up to the core count
        # (the extra steps only see zero-padded rows, sliced off below).
        grid_len += cores - (grid_len % cores)

    tile_rows = tile_p * pack                       # logical rows per grid step
    b_pad = grid_len * tile_rows
    if b_pad != B:
        x = jnp.pad(x, ((0, b_pad - B), (0, 0)))

    # Free row-major reinterpretation: (b_pad, input_dim) -> (b_pad/pack, in_p)
    x_packed = x.reshape(b_pad // pack, in_p)

    full = lambda shape: pl.BlockSpec(shape, lambda i: (0, 0))

    n_prow_pad = b_pad // pack
    flops = 2 * n_prow_pad * (in_p * hid_p + hid_p * hid_p + hid_p * out_p)
    wbytes = (packed["w1"].size + packed["w2"].size + packed["w3"].size) \
        * packed["w1"].dtype.itemsize
    bytes_accessed = (4 * n_prow_pad * (in_p + out_p) + wbytes
                      + 4 * (2 * hid_p + out_p))

    out_packed = pl.pallas_call(
        rule_encoder_kernel,
        out_shape=jax.ShapeDtypeStruct((n_prow_pad, out_p), dtype),
        grid_spec=pltpu.PrefetchScalarGridSpec(
            num_scalar_prefetch=0,
            grid=(grid_len,),
            in_specs=[
                pl.BlockSpec((tile_p, in_p), lambda i: (i, 0)),   # x tile
                full((in_p, hid_p)),      # w1 (packed, resident)
                full((1, hid_p)),         # b1
                full((hid_p, hid_p)),     # w2
                full((1, hid_p)),         # b2
                full((hid_p, out_p)),     # w3
                full((1, out_p)),         # b3
            ],
            out_specs=pl.BlockSpec((tile_p, out_p), lambda i: (i, 0)),
        ),
        compiler_params=pltpu.CompilerParams(
            dimension_semantics=("parallel",),
            vmem_limit_bytes=32 * 1024 * 1024),
        cost_estimate=pl.CostEstimate(
            flops=flops, transcendentals=0, bytes_accessed=bytes_accessed),
    )(x_packed, packed["w1"], packed["b1"], packed["w2"], packed["b2"],
      packed["w3"], packed["b3"])

    # Free reinterpretation back to (b_pad, output_dim); drop padded rows.
    return out_packed.reshape(b_pad, output_dim)[:B]


# ----------------------------------------------------------------------------
# Reference + init (mirrors the PyTorch module).
# ----------------------------------------------------------------------------
def init_params(key, input_dim, output_dim, hidden_dim=4):
    """Deterministic synthetic init (shapes mirror the nn.Linear layers)."""
    k1, k2, k3, k4, k5, k6 = jax.random.split(key, 6)
    s1 = 1.0 / jnp.sqrt(input_dim)
    s2 = 1.0 / jnp.sqrt(hidden_dim)
    return {
        # stored as (in, out): transpose of PyTorch's (out, in) weight layout
        "w1": jax.random.uniform(k1, (input_dim, hidden_dim), jnp.float32, -s1, s1),
        "b1": jax.random.uniform(k2, (1, hidden_dim), jnp.float32, -s1, s1),
        "w2": jax.random.uniform(k3, (hidden_dim, hidden_dim), jnp.float32, -s2, s2),
        "b2": jax.random.uniform(k4, (1, hidden_dim), jnp.float32, -s2, s2),
        "w3": jax.random.uniform(k5, (hidden_dim, output_dim), jnp.float32, -s2, s2),
        "b3": jax.random.uniform(k6, (1, output_dim), jnp.float32, -s2, s2),
    }


def reference_forward(x, p):
    h = jnp.maximum(x @ p["w1"] + p["b1"], 0.0)
    h = jnp.maximum(h @ p["w2"] + p["b2"], 0.0)
    return h @ p["w3"] + p["b3"]


if __name__ == "__main__":
    key = jax.random.PRNGKey(0)
    kx, kp = jax.random.split(key)

    batch, input_dim, hidden_dim, output_dim = 1024, 16, 4, 8
    x = jax.random.normal(kx, (batch, input_dim), jnp.float32)
    params = init_params(kp, input_dim, output_dim, hidden_dim)

    # One-time weight packing (hoisted out of the per-call path).
    packed, pack = pack_rule_encoder_params(params)   # f32 matmul inputs

    out = jax.block_until_ready(rule_encoder_forward(x, packed, pack=pack))
    ref = reference_forward(x, params)
    assert out.shape == (batch, output_dim)
    assert jnp.allclose(out, ref, atol=1e-5, rtol=1e-5)

    # Ragged batch (not a multiple of the pack/tile): exercises the padding path.
    x_odd = x[:1000]
    out_odd = jax.block_until_ready(rule_encoder_forward(x_odd, packed, pack=pack))
    assert out_odd.shape == (1000, output_dim)
    assert jnp.allclose(out_odd, reference_forward(x_odd, params),
                        atol=1e-5, rtol=1e-5)

    print("KERNEL_OK")
</pallas_src>

<mosaic_0001>
module attributes {stable_mosaic.version = 11 : i64} {
  func.func @rule_encoder_kernel(%arg0: i32, %arg1: memref<32x512xf32, #tpu.memory_space<vmem>>, %arg2: memref<512x128xf32, #tpu.memory_space<vmem>>, %arg3: memref<1x128xf32, #tpu.memory_space<vmem>>, %arg4: memref<128x128xf32, #tpu.memory_space<vmem>>, %arg5: memref<1x128xf32, #tpu.memory_space<vmem>>, %arg6: memref<128x256xf32, #tpu.memory_space<vmem>>, %arg7: memref<1x256xf32, #tpu.memory_space<vmem>>, %arg8: memref<32x256xf32, #tpu.memory_space<vmem>>) attributes {dimension_semantics = [#tpu.dimension_semantics<parallel>], iteration_bounds = array<i64: 1>, scalar_prefetch = 0 : i64, scratch_operands = 0 : i64, tpu.core_type = #tpu.core_type<tc>, window_params = [{transform_indices = @transform_0, window_bounds = array<i64: 32, 512>}, {pipeline_mode = #tpu.pipeline_mode<synchronous>, transform_indices = @transform_1, window_bounds = array<i64: 512, 128>}, {pipeline_mode = #tpu.pipeline_mode<synchronous>, transform_indices = @transform_2, window_bounds = array<i64: 1, 128>}, {pipeline_mode = #tpu.pipeline_mode<synchronous>, transform_indices = @transform_3, window_bounds = array<i64: 128, 128>}, {pipeline_mode = #tpu.pipeline_mode<synchronous>, transform_indices = @transform_4, window_bounds = array<i64: 1, 128>}, {pipeline_mode = #tpu.pipeline_mode<synchronous>, transform_indices = @transform_5, window_bounds = array<i64: 128, 256>}, {pipeline_mode = #tpu.pipeline_mode<synchronous>, transform_indices = @transform_6, window_bounds = array<i64: 1, 256>}, {transform_indices = @transform_7, window_bounds = array<i64: 32, 256>}]} {
    %c0 = arith.constant 0 : index
    %c0_0 = arith.constant 0 : index
    %0 = vector.load %arg1[%c0, %c0_0] : memref<32x512xf32, #tpu.memory_space<vmem>>, vector<32x512xf32>
    %c0_1 = arith.constant 0 : index
    %c0_2 = arith.constant 0 : index
    %1 = vector.load %arg2[%c0_1, %c0_2] : memref<512x128xf32, #tpu.memory_space<vmem>>, vector<512x128xf32>
    %cst = arith.constant dense<0.000000e+00> : vector<32x128xf32>
    %2 = tpu.matmul %0, %1, %cst {dimension_numbers = #tpu.dot_dimension_numbers<[1], [0], [0], [1], [0, 0, 1, 1], [], []>} : vector<32x512xf32>, vector<512x128xf32>, vector<32x128xf32> -> vector<32x128xf32>
    %c0_3 = arith.constant 0 : index
    %c0_4 = arith.constant 0 : index
    %3 = vector.load %arg3[%c0_3, %c0_4] : memref<1x128xf32, #tpu.memory_space<vmem>>, vector<1x128xf32>
    %4 = vector.broadcast %3 : vector<1x128xf32> to vector<32x128xf32>
    %5 = arith.addf %2, %4 : vector<32x128xf32>
    %cst_5 = arith.constant 0.000000e+00 : f32
    %6 = vector.broadcast %cst_5 : f32 to vector<32x128xf32>
    %7 = arith.maximumf %5, %6 : vector<32x128xf32>
    %c0_6 = arith.constant 0 : index
    %c0_7 = arith.constant 0 : index
    %8 = vector.load %arg4[%c0_6, %c0_7] : memref<128x128xf32, #tpu.memory_space<vmem>>, vector<128x128xf32>
    %cst_8 = arith.constant dense<0.000000e+00> : vector<32x128xf32>
    %9 = tpu.matmul %7, %8, %cst_8 {dimension_numbers = #tpu.dot_dimension_numbers<[1], [0], [0], [1], [0, 0, 1, 1], [], []>} : vector<32x128xf32>, vector<128x128xf32>, vector<32x128xf32> -> vector<32x128xf32>
    %c0_9 = arith.constant 0 : index
    %c0_10 = arith.constant 0 : index
    %10 = vector.load %arg5[%c0_9, %c0_10] : memref<1x128xf32, #tpu.memory_space<vmem>>, vector<1x128xf32>
    %11 = vector.broadcast %10 : vector<1x128xf32> to vector<32x128xf32>
    %12 = arith.addf %9, %11 : vector<32x128xf32>
    %cst_11 = arith.constant 0.000000e+00 : f32
    %13 = vector.broadcast %cst_11 : f32 to vector<32x128xf32>
    %14 = arith.maximumf %12, %13 : vector<32x128xf32>
    %c0_12 = arith.constant 0 : index
    %c0_13 = arith.constant 0 : index
    %15 = vector.load %arg6[%c0_12, %c0_13] : memref<128x256xf32, #tpu.memory_space<vmem>>, vector<128x256xf32>
    %cst_14 = arith.constant dense<0.000000e+00> : vector<32x256xf32>
    %16 = tpu.matmul %14, %15, %cst_14 {dimension_numbers = #tpu.dot_dimension_numbers<[1], [0], [0], [1], [0, 0, 1, 1], [], []>} : vector<32x128xf32>, vector<128x256xf32>, vector<32x256xf32> -> vector<32x256xf32>
    %c0_15 = arith.constant 0 : index
    %c0_16 = arith.constant 0 : index
    %17 = vector.load %arg7[%c0_15, %c0_16] : memref<1x256xf32, #tpu.memory_space<vmem>>, vector<1x256xf32>
    %18 = vector.broadcast %17 : vector<1x256xf32> to vector<32x256xf32>
    %19 = arith.addf %16, %18 : vector<32x256xf32>
    %c0_17 = arith.constant 0 : index
    %c0_18 = arith.constant 0 : index
    %20 = vector.load %arg8[%c0_17, %c0_18] : memref<32x256xf32, #tpu.memory_space<vmem>>, vector<32x256xf32>
    tpu.vector_store %arg8[%c0_17, %c0_18], %19 {strides = array<i32>} : memref<32x256xf32, #tpu.memory_space<vmem>>, vector<32x256xf32>,
    return
  }
  func.func @transform_0(%arg0: i32) -> (i32, i32) {
    %c0_i32 = arith.constant 0 : i32
    %c0_i32_0 = arith.constant 0 : i32
    return %arg0, %c0_i32 : i32, i32
  }
  func.func @transform_1(%arg0: i32) -> (i32, i32) {
    %c0_i32 = arith.constant 0 : i32
    %c0_i32_0 = arith.constant 0 : i32
    %c0_i32_1 = arith.constant 0 : i32
    return %c0_i32, %c0_i32_0 : i32, i32
  }
  func.func @transform_2(%arg0: i32) -> (i32, i32) {
    %c0_i32 = arith.constant 0 : i32
    %c0_i32_0 = arith.constant 0 : i32
    %c0_i32_1 = arith.constant 0 : i32
    return %c0_i32, %c0_i32_0 : i32, i32
  }
  func.func @transform_3(%arg0: i32) -> (i32, i32) {
    %c0_i32 = arith.constant 0 : i32
    %c0_i32_0 = arith.constant 0 : i32
    %c0_i32_1 = arith.constant 0 : i32
    return %c0_i32, %c0_i32_0 : i32, i32
  }
  func.func @transform_4(%arg0: i32) -> (i32, i32) {
    %c0_i32 = arith.constant 0 : i32
    %c0_i32_0 = arith.constant 0 : i32
    %c0_i32_1 = arith.constant 0 : i32
    return %c0_i32, %c0_i32_0 : i32, i32
  }
  func.func @transform_5(%arg0: i32) -> (i32, i32) {
    %c0_i32 = arith.constant 0 : i32
    %c0_i32_0 = arith.constant 0 : i32
    %c0_i32_1 = arith.constant 0 : i32
    return %c0_i32, %c0_i32_0 : i32, i32
  }
  func.func @transform_6(%arg0: i32) -> (i32, i32) {
    %c0_i32 = arith.constant 0 : i32
    %c0_i32_0 = arith.constant 0 : i32
    %c0_i32_1 = arith.constant 0 : i32
    return %c0_i32, %c0_i32_0 : i32, i32
  }
  func.func @transform_7(%arg0: i32) -> (i32, i32) {
    %c0_i32 = arith.constant 0 : i32
    %c0_i32_0 = arith.constant 0 : i32
    return %arg0, %c0_i32 : i32, i32
  }
}

</mosaic_0001>

<bundles_post_ra>
// kernel: rule_encoder_forward.1
= control target key start
LH: loop header
LB: loop body
LE: loop exit
PB: predicated region body
PF: predicated region fallthrough
CT: control target
= control target key end

     0   :  { %s872_s1 = inlined_call_operand.vmem [shape: f32[512,128], index: 1, kind: input, shape index: {}]   ;;  %s873_s2 = inlined_call_operand.vmem [shape: f32[1,128], index: 2, kind: input, shape index: {}]   ;;  %s874_s0 = inlined_call_operand.vmem [shape: f32[32,512], index: 0, kind: input, shape index: {}]   ;;  %s875_s3 = inlined_call_operand.vmem [shape: f32[128,128], index: 3, kind: input, shape index: {}]   ;;  %s876_s4 = inlined_call_operand.vmem [shape: f32[1,128], index: 4, kind: input, shape index: {}]   ;;  %s877_s5 = inlined_call_operand.vmem [shape: f32[128,256], index: 5, kind: input, shape index: {}]   ;;  %s878_s6 = inlined_call_operand.vmem [shape: f32[1,256], index: 6, kind: input, shape index: {}]   ;;  %s879_s7 = inlined_call_operand.vmem [shape: f32[32,256], index: 7, kind: output, shape index: {}]  }
   0x1   :  { %v89_v0 = vld [vmem:[%s872_s1 + $0x178] sm:$0xff]  ;;  %v88_v2 = vld [vmem:[%s872_s1 + $0x170] sm:$0xff]  ;;  %v87_v6 = vld [vmem:[%s872_s1 + $0x168] sm:$0xff] }
   0x2   :  { %v57_v1 = vld [vmem:[%s872_s1 + $0x78] sm:$0xff]  ;;  %168 = vmatpush.msra.mxu2 %v89_v0  ;;  %v56_v4 = vld [vmem:[%s872_s1 + $0x70] sm:$0xff]  ;;  %v55_v8 = vld [vmem:[%s872_s1 + $0x68] sm:$0xff] }
   0x3   :  { %110 = vmatpush.msra.mxu0 %v57_v1  ;;  %v105_v3 = vld [vmem:[%s872_s1 + $0x1f8] sm:$0xff]  ;;  %v104_v7 = vld [vmem:[%s872_s1 + $0x1f0] sm:$0xff]  ;;  %v103_v10 = vld [vmem:[%s872_s1 + $0x1e8] sm:$0xff] }
   0x4   :  { %v73_v5 = vld [vmem:[%s872_s1 + $0xf8] sm:$0xff]  ;;  %197 = vmatpush.msra.mxu3 %v105_v3  ;;  %169 = vmatpush.msra.mxu2 %v88_v2  ;;  %v72_v9 = vld [vmem:[%s872_s1 + $0xf0] sm:$0xff]  ;;  %v86_v11 = vld [vmem:[%s872_s1 + $0x160] sm:$0xff] }
   0x5   :  { %139 = vmatpush.msra.mxu1 %v73_v5  ;;  %111 = vmatpush.msra.mxu0 %v56_v4  ;;  %v54_v12 = vld [vmem:[%s872_s1 + $0x60] sm:$0xff]  ;;  %v71_v13 = vld [vmem:[%s872_s1 + $0xe8] sm:$0xff]  ;;  %v85_v16 = vld [vmem:[%s872_s1 + $0x158] sm:$0xff] }
   0x6   :  { %198 = vmatpush.msra.mxu3 %v104_v7  ;;  %170 = vmatpush.msra.mxu2 %v87_v6  ;;  %v102_v14 = vld [vmem:[%s872_s1 + $0x1e0] sm:$0xff]  ;;  %v53_v17 = vld [vmem:[%s872_s1 + $0x58] sm:$0xff]  ;;  %v84_v20 = vld [vmem:[%s872_s1 + $0x150] sm:$0xff] }
   0x7   :  { %140 = vmatpush.msra.mxu1 %v72_v9  ;;  %112 = vmatpush.msra.mxu0 %v55_v8  ;;  %v70_v15 = vld [vmem:[%s872_s1 + $0xe0] sm:$0xff]  ;;  %v101_v18 = vld [vmem:[%s872_s1 + $0x1d8] sm:$0xff]  ;;  %v52_v21 = vld [vmem:[%s872_s1 + $0x50] sm:$0xff] }
   0x8   :  { %199 = vmatpush.msra.mxu3 %v103_v10  ;;  %171 = vmatpush.msra.mxu2 %v86_v11  ;;  %v69_v19 = vld [vmem:[%s872_s1 + $0xd8] sm:$0xff]  ;;  %v100_v22 = vld [vmem:[%s872_s1 + $0x1d0] sm:$0xff]  ;;  %v83_v24 = vld [vmem:[%s872_s1 + $0x148] sm:$0xff] }
   0x9   :  { %141 = vmatpush.msra.mxu1 %v71_v13  ;;  %113 = vmatpush.msra.mxu0 %v54_v12  ;;  %v68_v23 = vld [vmem:[%s872_s1 + $0xd0] sm:$0xff]  ;;  %v51_v25 = vld [vmem:[%s872_s1 + $0x48] sm:$0xff]  ;;  %v82_v28 = vld [vmem:[%s872_s1 + $0x140] sm:$0xff] }
   0xa   :  { %200 = vmatpush.msra.mxu3 %v102_v14  ;;  %172 = vmatpush.msra.mxu2 %v85_v16  ;;  %v99_v26 = vld [vmem:[%s872_s1 + $0x1c8] sm:$0xff]  ;;  %v50_v29 = vld [vmem:[%s872_s1 + $0x40] sm:$0xff]  ;;  %v81_v32 = vld [vmem:[%s872_s1 + $0x138] sm:$0xff] }
   0xb   :  { %142 = vmatpush.msra.mxu1 %v70_v15  ;;  %114 = vmatpush.msra.mxu0 %v53_v17  ;;  %v67_v27 = vld [vmem:[%s872_s1 + $0xc8] sm:$0xff]  ;;  %v98_v30 = vld [vmem:[%s872_s1 + $0x1c0] sm:$0xff]  ;;  %v49_v33 = vld [vmem:[%s872_s1 + $0x38] sm:$0xff] }
   0xc   :  { %201 = vmatpush.msra.mxu3 %v101_v18  ;;  %173 = vmatpush.msra.mxu2 %v84_v20  ;;  %v66_v31 = vld [vmem:[%s872_s1 + $0xc0] sm:$0xff]  ;;  %v97_v34 = vld [vmem:[%s872_s1 + $0x1b8] sm:$0xff]  ;;  %v80_v36 = vld [vmem:[%s872_s1 + $0x130] sm:$0xff] }
   0xd   :  { %143 = vmatpush.msra.mxu1 %v69_v19  ;;  %115 = vmatpush.msra.mxu0 %v52_v21  ;;  %v65_v35 = vld [vmem:[%s872_s1 + $0xb8] sm:$0xff]  ;;  %v48_v37 = vld [vmem:[%s872_s1 + $0x30] sm:$0xff]  ;;  %v79_v40 = vld [vmem:[%s872_s1 + $0x128] sm:$0xff] }
   0xe   :  { %202 = vmatpush.msra.mxu3 %v100_v22  ;;  %174 = vmatpush.msra.mxu2 %v83_v24  ;;  %v96_v38 = vld [vmem:[%s872_s1 + $0x1b0] sm:$0xff]  ;;  %v47_v41 = vld [vmem:[%s872_s1 + $0x28] sm:$0xff]  ;;  %v78_v44 = vld [vmem:[%s872_s1 + $0x120] sm:$0xff] }
   0xf   :  { %144 = vmatpush.msra.mxu1 %v68_v23  ;;  %116 = vmatpush.msra.mxu0 %v51_v25  ;;  %v64_v39 = vld [vmem:[%s872_s1 + $0xb0] sm:$0xff]  ;;  %v95_v42 = vld [vmem:[%s872_s1 + $0x1a8] sm:$0xff]  ;;  %v46_v45 = vld [vmem:[%s872_s1 + $0x20] sm:$0xff] }
  0x10   :  { %203 = vmatpush.msra.mxu3 %v99_v26  ;;  %175 = vmatpush.msra.mxu2 %v82_v28  ;;  %v63_v43 = vld [vmem:[%s872_s1 + $0xa8] sm:$0xff]  ;;  %v94_v46 = vld [vmem:[%s872_s1 + $0x1a0] sm:$0xff]  ;;  %v77_v48 = vld [vmem:[%s872_s1 + $0x118] sm:$0xff] }
  0x11   :  { %145 = vmatpush.msra.mxu1 %v67_v27  ;;  %117 = vmatpush.msra.mxu0 %v50_v29  ;;  %v62_v47 = vld [vmem:[%s872_s1 + $0xa0] sm:$0xff]  ;;  %v45_v49 = vld [vmem:[%s872_s1 + $0x18] sm:$0xff]  ;;  %v76_v52 = vld [vmem:[%s872_s1 + $0x110] sm:$0xff] }
  0x12   :  { %204 = vmatpush.msra.mxu3 %v98_v30  ;;  %176 = vmatpush.msra.mxu2 %v81_v32  ;;  %v93_v50 = vld [vmem:[%s872_s1 + $0x198] sm:$0xff]  ;;  %v44_v53 = vld [vmem:[%s872_s1 + $0x10] sm:$0xff]  ;;  %v75_v56 = vld [vmem:[%s872_s1 + $0x108] sm:$0xff] }
  0x13   :  { %146 = vmatpush.msra.mxu1 %v66_v31  ;;  %118 = vmatpush.msra.mxu0 %v49_v33  ;;  %v61_v51 = vld [vmem:[%s872_s1 + $0x98] sm:$0xff]  ;;  %v92_v54 = vld [vmem:[%s872_s1 + $0x190] sm:$0xff]  ;;  %v43_v57 = vld [vmem:[%s872_s1 + $0x8] sm:$0xff] }
  0x14   :  { %205 = vmatpush.msra.mxu3 %v97_v34  ;;  %177 = vmatpush.msra.mxu2 %v80_v36  ;;  %v60_v55 = vld [vmem:[%s872_s1 + $0x90] sm:$0xff]  ;;  %v91_v58 = vld [vmem:[%s872_s1 + $0x188] sm:$0xff]  ;;  %v74_v60 = vld [vmem:[%s872_s1 + $0x100] sm:$0xff] }
  0x15   :  { %147 = vmatpush.msra.mxu1 %v65_v35  ;;  %119 = vmatpush.msra.mxu0 %v48_v37  ;;  %v59_v59 = vld [vmem:[%s872_s1 + $0x88] sm:$0xff]  ;;  %v42_v61 = vld [vmem:[%s872_s1] sm:$0xff]  ;;  %v28_v62 = vld [vmem:[%s874_s0 + $0x10] sm:$0xff] }
  0x16   :  { %206 = vmatpush.msra.mxu3 %v96_v38  ;;  %178 = vmatpush.msra.mxu2 %v79_v40  ;;  %v90_v63 = vld [vmem:[%s872_s1 + $0x180] sm:$0xff]  ;;  %v29_v1 = vld [vmem:[%s874_s0 + $0x18] sm:$0xff]  ;;  %v27_v4 = vld [vmem:[%s874_s0 + $0x8] sm:$0xff] }
  0x17   :  { %148 = vmatpush.msra.mxu1 %v64_v39  ;;  %120 = vmatpush.msra.mxu0 %v47_v41  ;;  %v26_v0 = vld [vmem:[%s874_s0] sm:$0xff]  ;;  %v245_v3 = vld [vmem:[%s875_s3 + $0x78] sm:$0xff]  ;;  %v244_v5 = vld [vmem:[%s875_s3 + $0x70] sm:$0xff] }
  0x18   :  { %207 = vmatpush.msra.mxu3 %v95_v42  ;;  %179 = vmatpush.msra.mxu2 %v78_v44  ;;  %v58_v2 = vld [vmem:[%s872_s1 + $0x80] sm:$0xff]  ;;  %v243_v6 = vld [vmem:[%s875_s3 + $0x68] sm:$0xff]  ;;  %v32_v7 = vld [vmem:[%s874_s0 + $0x30] sm:$0xff] }
  0x19   :  { %149 = vmatpush.msra.mxu1 %v63_v43  ;;  %121 = vmatpush.msra.mxu0 %v46_v45  ;;  %v242_v8 = vld [vmem:[%s875_s3 + $0x60] sm:$0xff]  ;;  %v33_v10 = vld [vmem:[%s874_s0 + $0x38] sm:$0xff]  ;;  %v31_v12 = vld [vmem:[%s874_s0 + $0x28] sm:$0xff] }
  0x1a   :  { %208 = vmatpush.msra.mxu3 %v94_v46  ;;  %180 = vmatpush.msra.mxu2 %v77_v48  ;;  %v30_v9 = vld [vmem:[%s874_s0 + $0x20] sm:$0xff]  ;;  %v241_v11 = vld [vmem:[%s875_s3 + $0x58] sm:$0xff]  ;;  %v240_v13 = vld [vmem:[%s875_s3 + $0x50] sm:$0xff] }
  0x1b   :  { %150 = vmatpush.msra.mxu1 %v62_v47  ;;  %122 = vmatpush.msra.mxu0 %v45_v49  ;;  %v239_v14 = vld [vmem:[%s875_s3 + $0x48] sm:$0xff]  ;;  %v36_v15 = vld [vmem:[%s874_s0 + $0x50] sm:$0xff]  ;;  %v238_v16 = vld [vmem:[%s875_s3 + $0x40] sm:$0xff] }
  0x1c   :  { %209 = vmatpush.msra.mxu3 %v93_v50  ;;  %181 = vmatpush.msra.mxu2 %v76_v52  ;;  %v34_v17 = vld [vmem:[%s874_s0 + $0x40] sm:$0xff]  ;;  %v37_v18 = vld [vmem:[%s874_s0 + $0x58] sm:$0xff]  ;;  %v35_v20 = vld [vmem:[%s874_s0 + $0x48] sm:$0xff] }
  0x1d   :  { %151 = vmatpush.msra.mxu1 %v61_v51  ;;  %123 = vmatpush.msra.mxu0 %v44_v53  ;;  %v237_v19 = vld [vmem:[%s875_s3 + $0x38] sm:$0xff]  ;;  %v236_v21 = vld [vmem:[%s875_s3 + $0x30] sm:$0xff]  ;;  %v38_v23 = vld [vmem:[%s874_s0 + $0x60] sm:$0xff] }
  0x1e   :  { %210 = vmatpush.msra.mxu3 %v92_v54  ;;  %182 = vmatpush.msra.mxu2 %v75_v56  ;;  %v40_v22 = vld [vmem:[%s874_s0 + $0x70] sm:$0xff]  ;;  %v41_v24 = vld [vmem:[%s874_s0 + $0x78] sm:$0xff]  ;;  %v39_v25 = vld [vmem:[%s874_s0 + $0x68] sm:$0xff] }
  0x1f   :  { %152 = vmatpush.msra.mxu1 %v60_v55  ;;  %124 = vmatpush.msra.mxu0 %v43_v57  ;;  %v235_v26 = vld [vmem:[%s875_s3 + $0x28] sm:$0xff]  ;;  %v234_v27 = vld [vmem:[%s875_s3 + $0x20] sm:$0xff]  ;;  %v233_v28 = vld [vmem:[%s875_s3 + $0x18] sm:$0xff] }
  0x20   :  { %211 = vmatpush.msra.mxu3 %v91_v58  ;;  %183 = vmatpush.msra.mxu2 %v74_v60  ;;  %v232_v29 = vld [vmem:[%s875_s3 + $0x10] sm:$0xff]  ;;  %v231_v30 = vld [vmem:[%s875_s3 + $0x8] sm:$0xff]  ;;  %v230_v31 = vld [vmem:[%s875_s3] sm:$0xff] }
  0x21   :  { %153 = vmatpush.msra.mxu1 %v59_v59  ;;  %125 = vmatpush.msra.mxu0 %v42_v61  ;;  %v740_v32 = vld [vmem:[%s873_s2] ss:$0 sm:$0xff]  ;;  %v313_v37 = vld [vmem:[%s877_s5 + $0xf0] sm:$0xff]  ;;  %v314_v38 = vld [vmem:[%s877_s5 + $0xf8] sm:$0xff] }
  0x22   :  { %184 = vmatmul.f32.vlgmr.msra.gmra.mxu2 %v28_v62  ;;  %212 = vmatpush.msra.mxu3 %v90_v63  ;;  %v311_v39 = vld [vmem:[%s877_s5 + $0xe0] sm:$0xff]  ;;  %v312_v41 = vld [vmem:[%s877_s5 + $0xe8] sm:$0xff]  ;;  %v309_v44 = vld [vmem:[%s877_s5 + $0xd0] sm:$0xff] }
  0x23   :  { %126 = vmatmul.f32.vlgmr.msra.gmra.mxu0 %v26_v0  ;;  %213 = vmatmul.f32.vlgmr.msra.gmra.mxu3 %v29_v1  ;;  %v310_v45 = vld [vmem:[%s877_s5 + $0xd8] sm:$0xff]  ;;  %v307_v48 = vld [vmem:[%s877_s5 + $0xc0] sm:$0xff]  ;;  %v308_v49 = vld [vmem:[%s877_s5 + $0xc8] sm:$0xff] }
  0x24   :  { %154 = vmatpush.msra.mxu1 %v58_v2  ;;  %250 = vmatpush.msrb.mxu0 %v245_v3  ;;  %v305_v53 = vld [vmem:[%s877_s5 + $0xb0] sm:$0xff]  ;;  %v306_v54 = vld [vmem:[%s877_s5 + $0xb8] sm:$0xff]  ;;  %v303_v56 = vld [vmem:[%s877_s5 + $0xa0] sm:$0xff] }
  0x25   :  { %155 = vmatmul.f32.vlgmr.msra.gmra.mxu1 %v27_v4  ;;  %391 = vmatpush.msrb.mxu3 %v245_v3  ;;  %v304_v57 = vld [vmem:[%s877_s5 + $0xa8] sm:$0xff]  ;;  %v301_v61 = vld [vmem:[%s877_s5 + $0x90] sm:$0xff]  ;;  %v302_v62 = vld [vmem:[%s877_s5 + $0x98] sm:$0xff] }
  0x26   :  { %251 = vmatpush.msrb.mxu0 %v244_v5  ;;  %321 = vmatpush.msrb.mxu1 %v313_v37  ;;  %v299_v1 = vld [vmem:[%s877_s5 + $0x80] sm:$0xff]  ;;  %v300_v2 = vld [vmem:[%s877_s5 + $0x88] sm:$0xff] }
  0x27   :  { %392 = vmatpush.msrb.mxu3 %v244_v5  ;;  %350 = vmatpush.msrb.mxu2 %v314_v38  ;;  %v408_v37 = vld [vmem:[%s876_s4] ss:$0 sm:$0xff] }
  0x28   :  { %252 = vmatpush.msrb.mxu0 %v243_v6  ;;  %322 = vmatpush.msrb.mxu1 %v311_v39 }
  0x29   :  { %393 = vmatpush.msrb.mxu3 %v243_v6  ;;  %351 = vmatpush.msrb.mxu2 %v312_v41  ;;  %v297_v6 = vld [vmem:[%s877_s5 + $0x70] sm:$0xff] }
  0x2a   :  { %187 = vmatmul.f32.gmra.mxu2 %v32_v7  ;;  %253 = vmatpush.msrb.mxu0 %v242_v8  ;;  %v298_v7 = vld [vmem:[%s877_s5 + $0x78] sm:$0xff] }
  0x2b   :  { %129 = vmatmul.f32.gmra.mxu0 %v30_v9  ;;  %216 = vmatmul.f32.gmra.mxu3 %v33_v10  ;;  %v295_v9 = vld [vmem:[%s877_s5 + $0x60] sm:$0xff]  ;;  %v296_v10 = vld [vmem:[%s877_s5 + $0x68] sm:$0xff] }
  0x2c   :  { %254 = vmatpush.msrb.mxu0 %v241_v11  ;;  %394 = vmatpush.msrb.mxu3 %v242_v8 }
  0x2d   :  { %158 = vmatmul.f32.gmra.mxu1 %v31_v12  ;;  %352 = vmatpush.msrb.mxu2 %v310_v45 }
  0x2e   :  { %255 = vmatpush.msrb.mxu0 %v240_v13  ;;  %395 = vmatpush.msrb.mxu3 %v241_v11 }
  0x2f   :  { %323 = vmatpush.msrb.mxu1 %v309_v44  ;;  %353 = vmatpush.msrb.mxu2 %v308_v49 }
  0x30   :  { %256 = vmatpush.msrb.mxu0 %v239_v14  ;;  %396 = vmatpush.msrb.mxu3 %v240_v13 }
  0x31   :  { %324 = vmatpush.msrb.mxu1 %v307_v48  ;;  %354 = vmatpush.msrb.mxu2 %v306_v54 }
  0x32   :  { %190 = vmatmul.f32.gmra.mxu2 %v36_v15  ;;  %257 = vmatpush.msrb.mxu0 %v238_v16  ;;  %v294_v15 = vld [vmem:[%s877_s5 + $0x58] sm:$0xff] }
  0x33   :  { %132 = vmatmul.f32.gmra.mxu0 %v34_v17  ;;  %219 = vmatmul.f32.gmra.mxu3 %v37_v18  ;;  %v291_v18 = vld [vmem:[%s877_s5 + $0x40] sm:$0xff] }
  0x34   :  { %258 = vmatpush.msrb.mxu0 %v237_v19  ;;  %397 = vmatpush.msrb.mxu3 %v239_v14  ;;  %v293_v14 = vld [vmem:[%s877_s5 + $0x50] sm:$0xff] }
  0x35   :  { %161 = vmatmul.f32.gmra.mxu1 %v35_v20  ;;  %355 = vmatpush.msrb.mxu2 %v304_v57 }
  0x36   :  { %259 = vmatpush.msrb.mxu0 %v236_v21  ;;  %398 = vmatpush.msrb.mxu3 %v238_v16 }
  0x37   :  { %325 = vmatpush.msrb.mxu1 %v305_v53  ;;  %356 = vmatpush.msrb.mxu2 %v302_v62 }
  0x38   :  { %399 = vmatpush.msrb.mxu3 %v237_v19  ;;  %260 = vmatpush.msrb.mxu0 %v235_v26  ;;  %v292_v19 = vld [vmem:[%s877_s5 + $0x48] sm:$0xff] }
  0x39   :  { %326 = vmatpush.msrb.mxu1 %v303_v56  ;;  %357 = vmatpush.msrb.mxu2 %v300_v2 }
  0x3a   :  { %193 = vmatmul.f32.gmra.mxu2 %v40_v22  ;;  %400 = vmatpush.msrb.mxu3 %v236_v21 }
  0x3b   :  { %135 = vmatmul.f32.gmra.mxu0 %v38_v23  ;;  %222 = vmatmul.f32.gmra.mxu3 %v41_v24  ;;  %v289_v23 = vld [vmem:[%s877_s5 + $0x30] sm:$0xff]  ;;  %v290_v24 = vld [vmem:[%s877_s5 + $0x38] sm:$0xff] }
  0x3c   :  { %401 = vmatpush.msrb.mxu3 %v235_v26  ;;  %261 = vmatpush.msrb.mxu0 %v234_v27 }
  0x3d   :  { %164 = vmatmul.f32.gmra.mxu1 %v39_v25  ;;  %358 = vmatpush.msrb.mxu2 %v298_v7 }
  0x3e   :  { %402 = vmatpush.msrb.mxu3 %v234_v27  ;;  %262 = vmatpush.msrb.mxu0 %v233_v28 }
  0x3f   :  { %327 = vmatpush.msrb.mxu1 %v301_v61  ;;  %359 = vmatpush.msrb.mxu2 %v296_v10 }
  0x40   :  { %403 = vmatpush.msrb.mxu3 %v233_v28  ;;  %263 = vmatpush.msrb.mxu0 %v232_v29 }
  0x41   :  { %328 = vmatpush.msrb.mxu1 %v299_v1  ;;  %360 = vmatpush.msrb.mxu2 %v294_v15 }
  0x42   :  { %404 = vmatpush.msrb.mxu3 %v232_v29  ;;  %264 = vmatpush.msrb.mxu0 %v231_v30 }
  0x43   :  { %329 = vmatpush.msrb.mxu1 %v297_v6  ;;  %361 = vmatpush.msrb.mxu2 %v292_v19 }
  0x44   :  { %405 = vmatpush.msrb.mxu3 %v231_v30  ;;  %265 = vmatpush.msrb.mxu0 %v230_v31 }
  0x45   :  { %330 = vmatpush.msrb.mxu1 %v295_v9  ;;  %362 = vmatpush.msrb.mxu2 %v290_v24 }
  0x46   :  { %406 = vmatpush.msrb.mxu3 %v230_v31  ;;  %v287_v31 = vld [vmem:[%s877_s5 + $0x20] sm:$0xff] }
  0x47   :  { %331 = vmatpush.msrb.mxu1 %v293_v14 }
  0x49   :  { %332 = vmatpush.msrb.mxu1 %v291_v18 }
  0x4b   :  { %333 = vmatpush.msrb.mxu1 %v289_v23 }
  0x4d   :  { %334 = vmatpush.msrb.mxu1 %v287_v31 }
  0xa0   :  { %v127_v33 = vpop.f32.mrf.mxu0 }
  0xa1   :  { %v128_v34 = vadd.f32 %v740_v32, %v127_v33  ;;  %v285_v33 = vld [vmem:[%s877_s5 + $0x10] sm:$0xff] }
  0xa2   :  { %v156_v35 = vpop.f32.mrf.mxu1  ;;  %335 = vmatpush.msrb.mxu1 %v285_v33 }
  0xa3   :  { %v157_v36 = vadd.f32 %v156_v35, %v128_v34  ;;  %v286_v34 = vld [vmem:[%s877_s5 + $0x18] sm:$0xff]  ;;  %v283_v35 = vld [vmem:[%s877_s5] sm:$0xff] }
  0xa4   :  { %336 = vmatpush.msrb.mxu1 %v283_v35 }
  0xa5   :  { %v185_v40 = vpop.f32.mrf.mxu2 }
  0xa6   :  { %v186_v42 = vadd.f32 %v185_v40, %v157_v36  ;;  %v214_v43 = vpop.f32.mrf.mxu3  ;;  %v284_v36 = vld [vmem:[%s877_s5 + $0x8] sm:$0xff] }
  0xa8   :  { %v215_v46 = vadd.f32 %v214_v43, %v186_v42  ;;  %v130_v47 = vpop.f32.mrf.mxu0 }
  0xa9   :  { %v131_v50 = vadd.f32 %v740_v32, %v130_v47 }
  0xaa   :  { %v226_v51 = vmax.f32 %v215_v46, 0.0  ;;  %v159_v52 = vpop.f32.mrf.mxu1 }
  0xab   :  { %v160_v55 = vadd.f32 %v159_v52, %v131_v50  ;;  %v315_v50 = vld [vmem:[%s878_s6] sm:$0x3] }
  0xac   :  { %266 = vmatmul.f32.vlgmr.msrb.gmra.mxu0 %v226_v51  ;;  %v317_v51 = vperm.slane %v315_v50, 0  ;;  %v318_v54 = vperm.slane %v315_v50, 1 }
  0xad   :  { %v188_v58 = vpop.f32.mrf.mxu2 }
  0xae   :  { %v189_v59 = vadd.f32 %v188_v58, %v160_v55  ;;  %v217_v60 = vpop.f32.mrf.mxu3 }
  0xb0   :  { %v218_v63 = vadd.f32 %v217_v60, %v189_v59  ;;  %v133_v0 = vpop.f32.mrf.mxu0 }
  0xb1   :  { %v134_v3 = vadd.f32 %v740_v32, %v133_v0 }
  0xb2   :  { %v227_v4 = vmax.f32 %v218_v63, 0.0  ;;  %v162_v5 = vpop.f32.mrf.mxu1 }
  0xb3   :  { %v163_v8 = vadd.f32 %v162_v5, %v134_v3 }
  0xb4   :  { %269 = vmatmul.f32.vlgmr.msrb.gmra.mxu3 %v227_v4 }
  0xb5   :  { %v191_v11 = vpop.f32.mrf.mxu2 }
  0xb6   :  { %v192_v12 = vadd.f32 %v191_v11, %v163_v8  ;;  %v220_v13 = vpop.f32.mrf.mxu3 }
  0xb8   :  { %v221_v16 = vadd.f32 %v220_v13, %v192_v12  ;;  %v136_v17 = vpop.f32.mrf.mxu0 }
  0xb9   :  { %v137_v20 = vadd.f32 %v740_v32, %v136_v17  ;;  %v288_v32 = vld [vmem:[%s877_s5 + $0x28] sm:$0xff] }
  0xba   :  { %v228_v21 = vmax.f32 %v221_v16, 0.0  ;;  %v165_v22 = vpop.f32.mrf.mxu1  ;;  %363 = vmatpush.msrb.mxu2 %v288_v32 }
  0xbb   :  { %v166_v25 = vadd.f32 %v165_v22, %v137_v20 }
  0xbc   :  { %272 = vmatmul.f32.gmra.mxu3 %v228_v21  ;;  %364 = vmatpush.msrb.mxu2 %v286_v34 }
  0xbd   :  { %v194_v26 = vpop.f32.mrf.mxu2 }
  0xbe   :  { %v195_v27 = vadd.f32 %v194_v26, %v166_v25  ;;  %v223_v28 = vpop.f32.mrf.mxu3  ;;  %365 = vmatpush.msrb.mxu2 %v284_v36 }
  0xc0   :  { %v224_v29 = vadd.f32 %v223_v28, %v195_v27 }
  0xc2   :  { %v229_v30 = vmax.f32 %v224_v29, 0.0 }
  0xc4   :  { %275 = vmatmul.f32.gmra.mxu3 %v229_v30 }
 0x129   :  { %v267_v38 = vpop.f32.mrf.mxu0 }
 0x12a   :  { %v268_v39 = vadd.f32 %v408_v37, %v267_v38 }
 0x12c   :  { %v279_v40 = vmax.f32 %v268_v39, 0.0 }
 0x12e   :  { %337 = vmatmul.f32.vlgmr.msrb.gmra.mxu1 %v279_v40  ;;  %366 = vmatmul.f32.vlgmr.msrb.gmra.mxu2 %v279_v40 }
 0x137   :  { %v270_v41 = vpop.f32.mrf.mxu3 }
 0x138   :  { %v271_v42 = vadd.f32 %v408_v37, %v270_v41 }
 0x13a   :  { %v280_v43 = vmax.f32 %v271_v42, 0.0 }
 0x13c   :  { %340 = vmatmul.f32.gmra.mxu1 %v280_v43  ;;  %369 = vmatmul.f32.gmra.mxu2 %v280_v43 }
 0x13f   :  { %v273_v44 = vpop.f32.mrf.mxu3 }
 0x140   :  { %v274_v45 = vadd.f32 %v408_v37, %v273_v44 }
 0x142   :  { %v281_v46 = vmax.f32 %v274_v45, 0.0 }
 0x144   :  { %343 = vmatmul.f32.gmra.mxu1 %v281_v46  ;;  %372 = vmatmul.f32.gmra.mxu2 %v281_v46 }
 0x147   :  { %v276_v47 = vpop.f32.mrf.mxu3 }
 0x148   :  { %v277_v48 = vadd.f32 %v408_v37, %v276_v47 }
 0x14a   :  { %v282_v49 = vmax.f32 %v277_v48, 0.0 }
 0x14c   :  { %346 = vmatmul.f32.gmra.mxu1 %v282_v49  ;;  %375 = vmatmul.f32.gmra.mxu2 %v282_v49 }
 0x1ab   :  { %v338_v52 = vpop.f32.mrf.mxu1 }
 0x1ac   :  { %v339_v53 = vadd.f32 %v338_v52, %v317_v51 }
 0x1ae   :  { %379 = vst [vmem:[%s879_s7] sm:$0xff] %v339_v53 }
 0x1b1   :  { %v367_v55 = vpop.f32.mrf.mxu2 }
 0x1b2   :  { %v368_v56 = vadd.f32 %v367_v55, %v318_v54 }
 0x1b4   :  { %380 = vst [vmem:[%s879_s7 + $0x8] sm:$0xff] %v368_v56 }
 0x1b9   :  { %v341_v57 = vpop.f32.mrf.mxu1 }
 0x1ba   :  { %v342_v58 = vadd.f32 %v341_v57, %v317_v51 }
 0x1bc   :  { %381 = vst [vmem:[%s879_s7 + $0x10] sm:$0xff] %v342_v58 }
 0x1bf   :  { %v370_v59 = vpop.f32.mrf.mxu2 }
 0x1c0   :  { %v371_v60 = vadd.f32 %v370_v59, %v318_v54 }
 0x1c1   :  { %v344_v61 = vpop.f32.mrf.mxu1 }
 0x1c2   :  { %382 = vst [vmem:[%s879_s7 + $0x18] sm:$0xff] %v371_v60  ;;  %v345_v62 = vadd.f32 %v344_v61, %v317_v51 }
 0x1c4   :  { %383 = vst [vmem:[%s879_s7 + $0x20] sm:$0xff] %v345_v62 }
 0x1c7   :  { %v373_v63 = vpop.f32.mrf.mxu2 }
 0x1c8   :  { %v374_v0 = vadd.f32 %v373_v63, %v318_v54 }
 0x1c9   :  { %v347_v1 = vpop.f32.mrf.mxu1 }
 0x1ca   :  { %384 = vst [vmem:[%s879_s7 + $0x28] sm:$0xff] %v374_v0  ;;  %v348_v2 = vadd.f32 %v347_v1, %v317_v51 }
 0x1cc   :  { %385 = vst [vmem:[%s879_s7 + $0x30] sm:$0xff] %v348_v2 }
 0x1cf   :  { %v376_v3 = vpop.f32.mrf.mxu2 }
 0x1d0   :  { %v377_v4 = vadd.f32 %v376_v3, %v318_v54 }
 0x1d2   :  { %386 = vst [vmem:[%s879_s7 + $0x38] sm:$0xff] %v377_v4 }

</bundles_post_ra>
